<compile_context>
chip_gen: v6e
topology: v6e:2x2x1
jax: 0.10.0
libtpu: 0.0.40
codegen_flags: <defaults>
</compile_context>

<pallas_src>
import math

import jax
import jax.numpy as jnp
from jax import lax
from jax.experimental import pallas as pl
from jax.experimental.pallas import tpu as pltpu

_BIG_NEG = -1e30  # disables masked logits; exp(_BIG_NEG - max) == 0 in f32


def _round_up(x, m):
    return ((x + m - 1) // m) * m


# ----------------------------- fused MHA kernel -----------------------------

def _make_mha_kernel(n_head, scale, has_att, has_pad, compute_dtype):
    def kernel(*refs):
        (q_in_ref, kv_in_ref, wq_ref, bq_ref, wkv_ref, bkv_ref,
         wo_ref, bo_ref) = refs[:8]
        idx = 8
        att_ref = None
        pad_ref = None
        if has_att:
            att_ref = refs[idx]; idx += 1
        if has_pad:
            pad_ref = refs[idx]; idx += 1
        o_ref = refs[idx]
        kv_scr = refs[idx + 1]

        tq = q_in_ref.shape[1]
        e = q_in_ref.shape[2]
        lk = kv_in_ref.shape[1]
        dh = e // n_head

        # --- fused K/V projection: once per batch element, cached in VMEM ---
        @pl.when(pl.program_id(1) == 0)
        def _():
            x_kv = kv_in_ref[0]                                   # (Lk, E)
            kv = (jnp.dot(x_kv, wkv_ref[...],
                          preferred_element_type=jnp.float32)
                  + bkv_ref[...])                                 # (Lk, 2E) f32
            kv_scr[...] = kv.astype(kv_scr.dtype)

        # --- Q projection: one wide (tq,E)@(E,E); softmax scale folded in ---
        x_q = q_in_ref[0]                                         # (tq, E)
        q = (jnp.dot(x_q, wq_ref[...], preferred_element_type=jnp.float32)
             + bq_ref[...]) * scale                               # (tq, E) f32

        kv = kv_scr[...]                                          # (Lk, 2E)
        k = kv[:, :e]
        v = kv[:, e:]

        # Head-batched layout: a single dot_general over all heads (no
        # per-head K=Dh lane slices, no Python head loop).
        q3 = q.astype(compute_dtype).reshape(tq, n_head, dh).transpose(1, 0, 2)
        k3 = k.reshape(lk, n_head, dh).transpose(1, 0, 2)         # (H, Lk, Dh)
        v3 = v.reshape(lk, n_head, dh).transpose(1, 0, 2)         # (H, Lk, Dh)

        # scores: (H, tq, Lk), f32 accumulation
        s = lax.dot_general(q3, k3, (((2,), (2,)), ((0,), (0,))),
                            preferred_element_type=jnp.float32)

        if has_att or has_pad:
            if has_att and has_pad:
                masked = (att_ref[...] != 0) | (pad_ref[0] != 0)  # (tq, Lk)
            elif has_att:
                masked = att_ref[...] != 0                        # (tq, Lk)
            else:
                masked = pad_ref[0] != 0                          # (1, Lk)
            s = jnp.where(masked[None, :, :], _BIG_NEG, s)

        # softmax in f32 with exact normalization
        s = s - jnp.max(s, axis=-1, keepdims=True)
        p = jnp.exp(s)
        p = p * (1.0 / jnp.sum(p, axis=-1, keepdims=True))

        # attention output per head: (H, tq, Dh)
        o3 = lax.dot_general(p.astype(compute_dtype), v3,
                             (((2,), (1,)), ((0,), (0,))),
                             preferred_element_type=jnp.float32)
        o2 = o3.transpose(1, 0, 2).reshape(tq, e)                 # (tq, E)

        # single wide output projection
        out = (jnp.dot(o2.astype(compute_dtype), wo_ref[...],
                       preferred_element_type=jnp.float32) + bo_ref[...])
        o_ref[0] = out.astype(o_ref.dtype)

    return kernel


# ------------------------------ module glue -------------------------------

def init_params(key, n_embd):
    """Deterministic init matching nn.MultiheadAttention parameter shapes."""
    k1, k2 = jax.random.split(key)
    bound_in = math.sqrt(6.0 / (n_embd + n_embd))
    in_proj_weight = jax.random.uniform(
        k1, (3 * n_embd, n_embd), jnp.float32, -bound_in, bound_in)
    in_proj_bias = jnp.zeros((3 * n_embd,), jnp.float32)
    bound_out = 1.0 / math.sqrt(n_embd)
    out_proj_weight = jax.random.uniform(
        k2, (n_embd, n_embd), jnp.float32, -bound_out, bound_out)
    out_proj_bias = jnp.zeros((n_embd,), jnp.float32)
    return {
        "in_proj_weight": in_proj_weight,
        "in_proj_bias": in_proj_bias,
        "out_proj_weight": out_proj_weight,
        "out_proj_bias": out_proj_bias,
    }


def multihead_attention(params, query, kv_cross, n_head,
                        padding_mask=None, att_mask=None,
                        compute_dtype=jnp.bfloat16):
    """Equivalent of MultiheadAttention.forward (returns attention output)."""
    B, Lq, E = query.shape
    Lk = kv_cross.shape[1]
    assert E % n_head == 0
    Dh = E // n_head
    scale = 1.0 / math.sqrt(Dh)
    out_dtype = query.dtype

    # q-row tiling: TQ=128 for production Lq, else pad to a multiple of 8.
    TQ = 128 if Lq >= 128 else _round_up(Lq, 8)
    Lq_pad = _round_up(Lq, TQ)
    n_q = Lq_pad // TQ
    if Lq_pad != Lq:
        query = jnp.pad(query, ((0, 0), (0, Lq_pad - Lq), (0, 0)))

    # Weight prep (tiny (E,E)-sized ops); MXU operands cast to compute_dtype,
    # biases stay f32 (added to f32 accumulators).
    wq, wk, wv = jnp.split(params["in_proj_weight"], 3, axis=0)   # (E, E) each
    bq, bk, bv = jnp.split(params["in_proj_bias"], 3)
    wq_t = wq.T.astype(compute_dtype)                             # (E, E)
    wkv_t = jnp.concatenate([wk.T, wv.T], axis=1).astype(compute_dtype)  # (E,2E)
    wo_t = params["out_proj_weight"].T.astype(compute_dtype)      # (E, E)
    bq2 = bq.reshape(1, E).astype(jnp.float32)
    bkv2 = jnp.concatenate([bk, bv]).reshape(1, 2 * E).astype(jnp.float32)
    bo2 = params["out_proj_bias"].reshape(1, E).astype(jnp.float32)

    q_in = query.astype(compute_dtype)
    kv_in = kv_cross.astype(compute_dtype)

    has_att = att_mask is not None
    has_pad = padding_mask is not None

    in_specs = [
        pl.BlockSpec((1, TQ, E), lambda b, i: (b, i, 0)),   # query tile
        pl.BlockSpec((1, Lk, E), lambda b, i: (b, 0, 0)),   # kv_cross (per b)
        pl.BlockSpec((E, E), lambda b, i: (0, 0)),          # Wq^T
        pl.BlockSpec((1, E), lambda b, i: (0, 0)),          # bq
        pl.BlockSpec((E, 2 * E), lambda b, i: (0, 0)),      # [Wk^T | Wv^T]
        pl.BlockSpec((1, 2 * E), lambda b, i: (0, 0)),      # [bk | bv]
        pl.BlockSpec((E, E), lambda b, i: (0, 0)),          # Wo^T
        pl.BlockSpec((1, E), lambda b, i: (0, 0)),          # bo
    ]
    args = [q_in, kv_in, wq_t, bq2, wkv_t, bkv2, wo_t, bo2]
    mask_bytes = 0

    if has_att:  # compact int8 boolean mask (True == disallowed)
        att_i8 = att_mask.astype(jnp.int8)
        if Lq_pad != Lq:
            att_i8 = jnp.pad(att_i8, ((0, Lq_pad - Lq), (0, 0)))
        in_specs.append(pl.BlockSpec((TQ, Lk), lambda b, i: (i, 0)))
        args.append(att_i8)
        mask_bytes += att_i8.size
    if has_pad:  # compact (B, 1, Lk) int8 key-padding mask
        pad_i8 = padding_mask.astype(jnp.int8).reshape(B, 1, Lk)
        in_specs.append(pl.BlockSpec((1, 1, Lk), lambda b, i: (b, 0, 0)))
        args.append(pad_i8)
        mask_bytes += pad_i8.size

    kernel = _make_mha_kernel(n_head, scale, has_att, has_pad, compute_dtype)

    itemsize = jnp.dtype(compute_dtype).itemsize
    flops = B * (4 * Lq_pad * E * E + 4 * Lk * E * E + 4 * Lq_pad * Lk * E)
    bytes_accessed = (
        (q_in.size + kv_in.size + wq_t.size + wkv_t.size + wo_t.size) * itemsize
        + (bq2.size + bkv2.size + bo2.size) * 4
        + B * Lq_pad * E * 4 + mask_bytes)
    cost = pl.CostEstimate(flops=int(flops),
                           transcendentals=int(B * n_head * Lq_pad * Lk),
                           bytes_accessed=int(bytes_accessed))

    out = pl.pallas_call(
        kernel,
        out_shape=jax.ShapeDtypeStruct((B, Lq_pad, E), jnp.float32),
        grid=(B, n_q),
        in_specs=in_specs,
        out_specs=pl.BlockSpec((1, TQ, E), lambda b, i: (b, i, 0)),
        scratch_shapes=[pltpu.VMEM((Lk, 2 * E), compute_dtype)],  # projected KV cache
        compiler_params=pltpu.CompilerParams(
            dimension_semantics=("parallel", "arbitrary"),
            vmem_limit_bytes=32 * 1024 * 1024),
        cost_estimate=cost,
    )(*args)

    return out[:, :Lq, :].astype(out_dtype)


def reference_mha(params, query, kv_cross, n_head,
                  padding_mask=None, att_mask=None):
    """Pure-JAX reference (HIGHEST matmul precision for a stable baseline)."""
    B, Lq, E = query.shape
    Lk = kv_cross.shape[1]
    Dh = E // n_head
    hp = lax.Precision.HIGHEST
    wq, wk, wv = jnp.split(params["in_proj_weight"], 3, axis=0)
    bq, bk, bv = jnp.split(params["in_proj_bias"], 3)
    q = (jnp.dot(query, wq.T, precision=hp) + bq
         ).reshape(B, Lq, n_head, Dh).transpose(0, 2, 1, 3)
    k = (jnp.dot(kv_cross, wk.T, precision=hp) + bk
         ).reshape(B, Lk, n_head, Dh).transpose(0, 2, 1, 3)
    v = (jnp.dot(kv_cross, wv.T, precision=hp) + bv
         ).reshape(B, Lk, n_head, Dh).transpose(0, 2, 1, 3)
    s = jnp.einsum("bhqd,bhkd->bhqk", q, k, precision=hp) / math.sqrt(Dh)
    if att_mask is not None:
        s = jnp.where(att_mask[None, None, :, :], -jnp.inf, s)
    if padding_mask is not None:
        s = jnp.where(padding_mask[:, None, None, :], -jnp.inf, s)
    p = jax.nn.softmax(s, axis=-1)
    o = jnp.einsum("bhqk,bhkd->bhqd", p, v, precision=hp
                   ).transpose(0, 2, 1, 3).reshape(B, Lq, E)
    return jnp.dot(o, params["out_proj_weight"].T, precision=hp) \
        + params["out_proj_bias"]


# --------------------------------- main ------------------------------------

if __name__ == "__main__":
    # cfg: n_embd=32, n_head=4, dropout=0.0, bias=True
    n_embd, n_head = 32, 4
    B, Lq, Lk = 2, 8, 8

    key = jax.random.PRNGKey(0)
    k_params, k_q, k_kv = jax.random.split(key, 3)

    params = init_params(k_params, n_embd)
    query = jax.random.normal(k_q, (B, Lq, n_embd), jnp.float32)
    kv_cross = jax.random.normal(k_kv, (B, Lk, n_embd), jnp.float32)

    rows = jnp.arange(Lq)[:, None]
    cols = jnp.arange(Lk)[None, :]
    att_mask = cols > rows                                  # (Lq, Lk) bool
    padding_mask = jnp.zeros((B, Lk), dtype=bool).at[0, Lk - 1].set(True)

    # --- f32 MXU path: tight check against the reference ---
    out = multihead_attention(params, query, kv_cross, n_head,
                              compute_dtype=jnp.float32)
    out = jax.block_until_ready(out)
    ref = reference_mha(params, query, kv_cross, n_head)
    assert out.shape == (B, Lq, n_embd)
    assert jnp.allclose(out, ref, atol=5e-3, rtol=5e-3), \
        float(jnp.max(jnp.abs(out - ref)))

    out_m = multihead_attention(params, query, kv_cross, n_head,
                                padding_mask=padding_mask, att_mask=att_mask,
                                compute_dtype=jnp.float32)
    out_m = jax.block_until_ready(out_m)
    ref_m = reference_mha(params, query, kv_cross, n_head,
                          padding_mask=padding_mask, att_mask=att_mask)
    assert jnp.allclose(out_m, ref_m, atol=5e-3, rtol=5e-3), \
        float(jnp.max(jnp.abs(out_m - ref_m)))

    # --- production bf16-MXU path (f32 accumulation + f32 softmax) ---
    out_bf = multihead_attention(params, query, kv_cross, n_head,
                                 padding_mask=padding_mask, att_mask=att_mask,
                                 compute_dtype=jnp.bfloat16)
    out_bf = jax.block_until_ready(out_bf)
    assert jnp.allclose(out_bf, ref_m, atol=3e-2, rtol=3e-2), \
        float(jnp.max(jnp.abs(out_bf - ref_m)))

    print("KERNEL_OK")
</pallas_src>

<mosaic_0001>
module attributes {stable_mosaic.version = 11 : i64} {
  func.func @kernel(%arg0: i32, %arg1: i32, %arg2: memref<1x8x32xf32, #tpu.memory_space<vmem>>, %arg3: memref<1x8x32xf32, #tpu.memory_space<vmem>>, %arg4: memref<32x32xf32, #tpu.memory_space<vmem>>, %arg5: memref<1x32xf32, #tpu.memory_space<vmem>>, %arg6: memref<32x64xf32, #tpu.memory_space<vmem>>, %arg7: memref<1x64xf32, #tpu.memory_space<vmem>>, %arg8: memref<32x32xf32, #tpu.memory_space<vmem>>, %arg9: memref<1x32xf32, #tpu.memory_space<vmem>>, %arg10: memref<1x8x32xf32, #tpu.memory_space<vmem>>, %arg11: memref<8x64xf32, #tpu.memory_space<vmem>>) attributes {dimension_semantics = [#tpu.dimension_semantics<parallel>, #tpu.dimension_semantics<arbitrary>], iteration_bounds = array<i64: 2, 1>, scalar_prefetch = 0 : i64, scratch_operands = 1 : i64, tpu.core_type = #tpu.core_type<tc>, window_params = [{transform_indices = @transform_0, window_bounds = array<i64: 1, 8, 32>}, {transform_indices = @transform_1, window_bounds = array<i64: 1, 8, 32>}, {pipeline_mode = #tpu.pipeline_mode<synchronous>, transform_indices = @transform_2, window_bounds = array<i64: 32, 32>}, {pipeline_mode = #tpu.pipeline_mode<synchronous>, transform_indices = @transform_3, window_bounds = array<i64: 1, 32>}, {pipeline_mode = #tpu.pipeline_mode<synchronous>, transform_indices = @transform_4, window_bounds = array<i64: 32, 64>}, {pipeline_mode = #tpu.pipeline_mode<synchronous>, transform_indices = @transform_5, window_bounds = array<i64: 1, 64>}, {pipeline_mode = #tpu.pipeline_mode<synchronous>, transform_indices = @transform_6, window_bounds = array<i64: 32, 32>}, {pipeline_mode = #tpu.pipeline_mode<synchronous>, transform_indices = @transform_7, window_bounds = array<i64: 1, 32>}, {transform_indices = @transform_8, window_bounds = array<i64: 1, 8, 32>}]} {
    %c0_i32 = arith.constant 0 : i32
    %0 = arith.cmpi eq, %arg1, %c0_i32 : i32
    %1 = arith.extui %0 : i1 to i32
    %c0_i32_0 = arith.constant 0 : i32
    %2 = arith.cmpi ne, %1, %c0_i32_0 : i32
    scf.if %2 {
      %c0_23 = arith.constant 0 : index
      %c0_24 = arith.constant 0 : index
      %c0_25 = arith.constant 0 : index
      %44 = vector.load %arg3[%c0_23, %c0_24, %c0_25] : memref<1x8x32xf32, #tpu.memory_space<vmem>>, vector<1x8x32xf32>
      %45 = vector.shape_cast %44 : vector<1x8x32xf32> to vector<8x32xf32>
      %c0_26 = arith.constant 0 : index
      %c0_27 = arith.constant 0 : index
      %46 = vector.load %arg6[%c0_26, %c0_27] : memref<32x64xf32, #tpu.memory_space<vmem>>, vector<32x64xf32>
      %cst_28 = arith.constant dense<0.000000e+00> : vector<8x64xf32>
      %47 = tpu.matmul %45, %46, %cst_28 {dimension_numbers = #tpu.dot_dimension_numbers<[1], [0], [0], [1], [0, 0, 1, 1], [], []>} : vector<8x32xf32>, vector<32x64xf32>, vector<8x64xf32> -> vector<8x64xf32>
      %c0_29 = arith.constant 0 : index
      %c0_30 = arith.constant 0 : index
      %48 = vector.load %arg7[%c0_29, %c0_30] : memref<1x64xf32, #tpu.memory_space<vmem>>, vector<1x64xf32>
      %49 = vector.broadcast %48 : vector<1x64xf32> to vector<8x64xf32>
      %50 = arith.addf %47, %49 : vector<8x64xf32>
      %c0_31 = arith.constant 0 : index
      %c0_32 = arith.constant 0 : index
      %51 = vector.load %arg11[%c0_31, %c0_32] : memref<8x64xf32, #tpu.memory_space<vmem>>, vector<8x64xf32>
      tpu.vector_store %arg11[%c0_31, %c0_32], %50 {strides = array<i32>} : memref<8x64xf32, #tpu.memory_space<vmem>>, vector<8x64xf32>,
    } else {
    }
    %c0 = arith.constant 0 : index
    %c0_1 = arith.constant 0 : index
    %c0_2 = arith.constant 0 : index
    %3 = vector.load %arg2[%c0, %c0_1, %c0_2] : memref<1x8x32xf32, #tpu.memory_space<vmem>>, vector<1x8x32xf32>
    %4 = vector.shape_cast %3 : vector<1x8x32xf32> to vector<8x32xf32>
    %c0_3 = arith.constant 0 : index
    %c0_4 = arith.constant 0 : index
    %5 = vector.load %arg4[%c0_3, %c0_4] : memref<32x32xf32, #tpu.memory_space<vmem>>, vector<32x32xf32>
    %cst = arith.constant dense<0.000000e+00> : vector<8x32xf32>
    %6 = tpu.matmul %4, %5, %cst {dimension_numbers = #tpu.dot_dimension_numbers<[1], [0], [0], [1], [0, 0, 1, 1], [], []>} : vector<8x32xf32>, vector<32x32xf32>, vector<8x32xf32> -> vector<8x32xf32>
    %c0_5 = arith.constant 0 : index
    %c0_6 = arith.constant 0 : index
    %7 = vector.load %arg5[%c0_5, %c0_6] : memref<1x32xf32, #tpu.memory_space<vmem>>, vector<1x32xf32>
    %8 = vector.broadcast %7 : vector<1x32xf32> to vector<8x32xf32>
    %9 = arith.addf %6, %8 : vector<8x32xf32>
    %cst_7 = arith.constant 0.353553385 : f32
    %10 = vector.broadcast %cst_7 : f32 to vector<8x32xf32>
    %11 = arith.mulf %9, %10 : vector<8x32xf32>
    %c0_8 = arith.constant 0 : index
    %c0_9 = arith.constant 0 : index
    %12 = vector.load %arg11[%c0_8, %c0_9] : memref<8x64xf32, #tpu.memory_space<vmem>>, vector<8x64xf32>
    %13 = vector.extract_strided_slice %12 {offsets = [0, 0], sizes = [8, 32], strides = [1, 1]} : vector<8x64xf32> to vector<8x32xf32>
    %14 = vector.extract_strided_slice %12 {offsets = [0, 32], sizes = [8, 32], strides = [1, 1]} : vector<8x64xf32> to vector<8x32xf32>
    %15 = vector.shape_cast %11 : vector<8x32xf32> to vector<8x4x8xf32>
    %16 = tpu.transpose %15, [1, 0, 2] : vector<8x4x8xf32> -> vector<4x8x8xf32>
    %17 = vector.shape_cast %13 : vector<8x32xf32> to vector<8x4x8xf32>
    %18 = tpu.transpose %17, [1, 0, 2] : vector<8x4x8xf32> -> vector<4x8x8xf32>
    %19 = vector.shape_cast %14 : vector<8x32xf32> to vector<8x4x8xf32>
    %20 = tpu.transpose %19, [1, 0, 2] : vector<8x4x8xf32> -> vector<4x8x8xf32>
    %cst_10 = arith.constant dense<0.000000e+00> : vector<4x8x8xf32>
    %21 = tpu.matmul %16, %18, %cst_10 {dimension_numbers = #tpu.dot_dimension_numbers<[2], [2], [1], [1], [0, 0, 0, 1, 1, 1], [0], [0]>} : vector<4x8x8xf32>, vector<4x8x8xf32>, vector<4x8x8xf32> -> vector<4x8x8xf32>
    %cst_11 = arith.constant dense<0xFF800000> : vector<4x8xf32>
    %22 = vector.multi_reduction <maximumf>, %21, %cst_11 [2] : vector<4x8x8xf32> to vector<4x8xf32>
    %23 = vector.shape_cast %22 : vector<4x8xf32> to vector<4x8x1xf32>
    %24 = vector.broadcast %23 : vector<4x8x1xf32> to vector<4x8x8xf32>
    %25 = arith.subf %21, %24 : vector<4x8x8xf32>
    %26 = math.exp %25 : vector<4x8x8xf32>
    %cst_12 = arith.constant dense<0.000000e+00> : vector<4x8xf32>
    %27 = vector.multi_reduction <add>, %26, %cst_12 [2] : vector<4x8x8xf32> to vector<4x8xf32>
    %28 = vector.shape_cast %27 : vector<4x8xf32> to vector<4x8x1xf32>
    %cst_13 = arith.constant 1.000000e+00 : f32
    %29 = vector.broadcast %cst_13 : f32 to vector<4x8x1xf32>
    %30 = arith.divf %29, %28 : vector<4x8x1xf32>
    %31 = vector.broadcast %30 : vector<4x8x1xf32> to vector<4x8x8xf32>
    %32 = arith.mulf %26, %31 : vector<4x8x8xf32>
    %cst_14 = arith.constant dense<0.000000e+00> : vector<4x8x8xf32>
    %33 = tpu.matmul %32, %20, %cst_14 {dimension_numbers = #tpu.dot_dimension_numbers<[2], [1], [1], [2], [0, 0, 0, 1, 1, 2], [0], [0]>} : vector<4x8x8xf32>, vector<4x8x8xf32>, vector<4x8x8xf32> -> vector<4x8x8xf32>
    %34 = tpu.transpose %33, [1, 0, 2] : vector<4x8x8xf32> -> vector<8x4x8xf32>
    %35 = vector.shape_cast %34 : vector<8x4x8xf32> to vector<8x32xf32>
    %c0_15 = arith.constant 0 : index
    %c0_16 = arith.constant 0 : index
    %36 = vector.load %arg8[%c0_15, %c0_16] : memref<32x32xf32, #tpu.memory_space<vmem>>, vector<32x32xf32>
    %cst_17 = arith.constant dense<0.000000e+00> : vector<8x32xf32>
    %37 = tpu.matmul %35, %36, %cst_17 {dimension_numbers = #tpu.dot_dimension_numbers<[1], [0], [0], [1], [0, 0, 1, 1], [], []>} : vector<8x32xf32>, vector<32x32xf32>, vector<8x32xf32> -> vector<8x32xf32>
    %c0_18 = arith.constant 0 : index
    %c0_19 = arith.constant 0 : index
    %38 = vector.load %arg9[%c0_18, %c0_19] : memref<1x32xf32, #tpu.memory_space<vmem>>, vector<1x32xf32>
    %39 = vector.broadcast %38 : vector<1x32xf32> to vector<8x32xf32>
    %40 = arith.addf %37, %39 : vector<8x32xf32>
    %c0_20 = arith.constant 0 : index
    %c0_21 = arith.constant 0 : index
    %c0_22 = arith.constant 0 : index
    %41 = vector.load %arg10[%c0_20, %c0_21, %c0_22] : memref<1x8x32xf32, #tpu.memory_space<vmem>>, vector<1x8x32xf32>
    %42 = vector.shape_cast %41 : vector<1x8x32xf32> to vector<8x32xf32>
    %43 = vector.shape_cast %40 : vector<8x32xf32> to vector<1x8x32xf32>
    tpu.vector_store %arg10[%c0_20, %c0_21, %c0_22], %43 {strides = array<i32>} : memref<1x8x32xf32, #tpu.memory_space<vmem>>, vector<1x8x32xf32>,
    return
  }
  func.func @transform_0(%arg0: i32, %arg1: i32) -> (i32, i32, i32) {
    %c0_i32 = arith.constant 0 : i32
    %c0_i32_0 = arith.constant 0 : i32
    return %arg0, %arg1, %c0_i32 : i32, i32, i32
  }
  func.func @transform_1(%arg0: i32, %arg1: i32) -> (i32, i32, i32) {
    %c0_i32 = arith.constant 0 : i32
    %c0_i32_0 = arith.constant 0 : i32
    %c0_i32_1 = arith.constant 0 : i32
    return %arg0, %c0_i32, %c0_i32_0 : i32, i32, i32
  }
  func.func @transform_2(%arg0: i32, %arg1: i32) -> (i32, i32) {
    %c0_i32 = arith.constant 0 : i32
    %c0_i32_0 = arith.constant 0 : i32
    %c0_i32_1 = arith.constant 0 : i32
    return %c0_i32, %c0_i32_0 : i32, i32
  }
  func.func @transform_3(%arg0: i32, %arg1: i32) -> (i32, i32) {
    %c0_i32 = arith.constant 0 : i32
    %c0_i32_0 = arith.constant 0 : i32
    %c0_i32_1 = arith.constant 0 : i32
    return %c0_i32, %c0_i32_0 : i32, i32
  }
  func.func @transform_4(%arg0: i32, %arg1: i32) -> (i32, i32) {
    %c0_i32 = arith.constant 0 : i32
    %c0_i32_0 = arith.constant 0 : i32
    %c0_i32_1 = arith.constant 0 : i32
    return %c0_i32, %c0_i32_0 : i32, i32
  }
  func.func @transform_5(%arg0: i32, %arg1: i32) -> (i32, i32) {
    %c0_i32 = arith.constant 0 : i32
    %c0_i32_0 = arith.constant 0 : i32
    %c0_i32_1 = arith.constant 0 : i32
    return %c0_i32, %c0_i32_0 : i32, i32
  }
  func.func @transform_6(%arg0: i32, %arg1: i32) -> (i32, i32) {
    %c0_i32 = arith.constant 0 : i32
    %c0_i32_0 = arith.constant 0 : i32
    %c0_i32_1 = arith.constant 0 : i32
    return %c0_i32, %c0_i32_0 : i32, i32
  }
  func.func @transform_7(%arg0: i32, %arg1: i32) -> (i32, i32) {
    %c0_i32 = arith.constant 0 : i32
    %c0_i32_0 = arith.constant 0 : i32
    %c0_i32_1 = arith.constant 0 : i32
    return %c0_i32, %c0_i32_0 : i32, i32
  }
  func.func @transform_8(%arg0: i32, %arg1: i32) -> (i32, i32, i32) {
    %c0_i32 = arith.constant 0 : i32
    %c0_i32_0 = arith.constant 0 : i32
    return %arg0, %arg1, %c0_i32 : i32, i32, i32
  }
}

</mosaic_0001>

<bundles_post_ra>
// kernel: tpu_custom_call.1
= control target key start
LH: loop header
LB: loop body
LE: loop exit
PB: predicated region body
PF: predicated region fallthrough
CT: control target
= control target key end

     0   :  { %s3038_s0 = inlined_call_operand.hbm [shape: f32[2,8,32], index: 0, kind: input, shape index: {}]   ;;  %s3039_s1 = inlined_call_operand.hbm [shape: f32[2,8,32], index: 1, kind: input, shape index: {}]   ;;  %s3040_s2 = inlined_call_operand.hbm [shape: f32[32,32], index: 2, kind: input, shape index: {}]   ;;  %s3041_s3 = inlined_call_operand.vmem [shape: f32[1,32], index: 3, kind: input, shape index: {}]   ;;  %s3042_s4 = inlined_call_operand.hbm [shape: f32[32,64], index: 4, kind: input, shape index: {}]   ;;  %s3043_s5 = inlined_call_operand.vmem [shape: f32[1,64], index: 5, kind: input, shape index: {}]   ;;  %s3044_s6 = inlined_call_operand.hbm [shape: f32[32,32], index: 6, kind: input, shape index: {}]   ;;  %s3045_s7 = inlined_call_operand.vmem [shape: f32[1,32], index: 7, kind: input, shape index: {}]   ;;  %s3046_s8 = inlined_call_operand.hbm [shape: f32[2,8,32], index: 8, kind: output, shape index: {}]  }
   0x1   :  { %3051 = sst [smem:[#allocation20_spill]] %s3038_s0 }
   0x2   :  { %3052 = sst [smem:[#allocation21_spill]] %s3040_s2 }
   0x3   :  { %3053 = sst [smem:[#allocation22_spill]] %s3042_s4 }
   0x4   :  { %3054 = sst [smem:[#allocation23_spill]] %s3044_s6 }
   0x5   :  { %13 = vsyncpa [#allocation4], 0 }
   0x6   :  { %15 = vsyncpa [#allocation4 + $0x1], 0 }
   0x7   :  { %16 = vsyncpa [#allocation7], 0 }
   0x8   :  { %18 = vsyncpa [#allocation7 + $0x1], 0 }
   0x9   :  { %19 = vsyncpa [#allocation10], 0 }
   0xa   :  { %20 = vsyncpa [#allocation5], 0 }
   0xb   :  { %22 = vsyncpa [#allocation5 + $0x1], 0  ;;  %s2638_s27 = smov 0   ;;  %s2640_s28 = smov 0  }
   0xc   :  { %s2642_s29 = smov 0   ;;  %s2644_s30 = smov 0  }
   0xd   :  { %s2646_s9 = smov 0   ;;  %s2648_s10 = smov 0  }
   0xe LB: > { %s2669_s11 = sadd.s32 4294967295, %s2572_s10   ;;  %s2068_s12 = sadd.s32 4294967294, %s2572_s10   ;;  %s2572_s10 = sphi %s2648_s10, %s28_s10   ;;  %s2568_s9 = sphi %s2646_s9, %s3081_s9   ;;  %s2564_s30 = sphi %s2644_s30, %s3080_s30   ;;  %s2560_s29 = sphi %s2642_s29, %s3079_s29   ;;  %s2556_s28 = sphi %s2640_s28, %s3078_s28   ;;  %s2552_s27 = sphi %s2638_s27, %s3077_s27  }
   0xf   : > { %p62_p0 = scmp.ne.s32.totalorder %s2556_s28, %s2552_s27  ;;  %p3047_p1 = scmp.eq.s32.totalorder %s2669_s11, 0 }
  0x10   : > { %p246_p3 = scmp.eq.s32.totalorder %s2068_s12, 1  ;;  %p2069_p5 = scmp.ge.s32.totalorder %s2572_s10, 1 }
  0x11   : > { %p2678_p4 = por %p3047_p1, %p62_p0  ;;  %p253_p7 = scmp.lt.s32.totalorder %s2572_s10, 3 }
  0x12   : > { %p2683_p6 = por %p246_p3, %p62_p0  ;;  %s2574_s16 = smov [#allocation8]  }
  0x13   : > { %s3055_s13 = scalar_select %p2678_p4, 1, 0 }
  0x14   : > { %s3056_s14 = scalar_select %p2683_p6, 1, 0 }
  0x15   : > { %p2688_p8 = pnand %p2069_p5, %p253_p7  ;;  %s265_s17 = sshll.u32 %s2574_s16, 4  ;;  %s266_s17 = int_to_ptr.vmem [resolvable:$true] %s265_s17 }
  0x16   : > { %3057 = sst [smem:[#allocation18_spill]] %s3056_s14  ;;  %s2575_s19 = smov [#allocation9]  }
  0x17   : > { %p2237_p9 = pneg %p2688_p8  ;;  %s281_s20 = sshll.u32 %s2575_s19, 4  ;;  %s282_s20 = int_to_ptr.vmem [resolvable:$true] %s281_s20 }
  0x18   : > { %s2576_s21 = smov [#allocation11]   ;;  %s2357_s23 = scalar_lea.vmem %s266_s17, 512 }
  0x19   : > { %p2697_p11 = pnand %p2237_p9, %p3047_p1  ;;  %s297_s22 = sshll.u32 %s2576_s21, 4  ;;  %s298_s22 = int_to_ptr.vmem [resolvable:$true] %s297_s22 }
  0x1a   : > { %p2358_p13 = scmp.ne.s32.totalorder %s266_s17, %s2357_s23  ;;  %p2365_p5 = scmp.lt.s32.totalorder %s266_s17, %s266_s17 }
  0x1b   : > { %p2348_p12 = pneg %p2697_p11  ;;  %p2366_p7 = scmp.lt.s32.totalorder %s2357_s23, %s2357_s23 }
  0x1d   : > { %p2360_p0 = pnand %p2358_p13, %p2348_p12  ;;  %p2367_p9 = por %p2366_p7, %p2365_p5 }
  0x1f   : > { %p2361_p3 = pneg %p2360_p0 }
  0x21   : > { %p2368_p10 = pnand %p2367_p9, %p2361_p3 }
  0x23   : > { %2371 = shalt.err (!%p2368_p10)
}
  0x24   : > { %s2577_s24 = smov 128   ;;  %s2578_s25 = smov 8  }
  0x25   : > { %s3060_s2 = sld [smem:[#allocation21_spill]]  ;;  %s2383_s16 = scalar_lea.vmem %s282_s20, 512 }
  0x26   : > { %p2384_p1 = scmp.ne.s32.totalorder %s282_s20, %s2383_s16  ;;  %p2391_p2 = scmp.lt.s32.totalorder %s282_s20, %s282_s20 }
  0x27   : > { %p2392_p6 = scmp.lt.s32.totalorder %s2383_s16, %s2383_s16 }
  0x28   : > { %p2386_p13 = pnand %p2384_p1, %p2348_p12 }
  0x29   : > { %p2393_p5 = por %p2392_p6, %p2391_p2 }
  0x2a   : > { %p2387_p0 = pneg %p2386_p13 }
  0x2b   : > { %2240 = dma.hbm_to_vmem [thread:$0]  (!%p2697_p11), %s3060_s2, 512, %s266_s17, [#allocation7], %s2577_s24, %s2577_s24, %s2578_s25  }
  0x2c   : > { %p2394_p3 = pnand %p2393_p5, %p2387_p0 }
  0x2e   : > { %2397 = shalt.err (!%p2394_p3)
}
  0x2f   : > { %s3061_s4 = sld [smem:[#allocation22_spill]]  ;;  %s2409_s17 = scalar_lea.vmem %s298_s22, 512 }
  0x30   : > { %p2410_p10 = scmp.ne.s32.totalorder %s298_s22, %s2409_s17  ;;  %p2417_p9 = scmp.lt.s32.totalorder %s298_s22, %s298_s22 }
  0x31   : > { %p2418_p13 = scmp.lt.s32.totalorder %s2409_s17, %s2409_s17 }
  0x32   : > { %p2412_p7 = pnand %p2410_p10, %p2348_p12 }
  0x33   : > { %p2419_p4 = por %p2418_p13, %p2417_p9 }
  0x34   : > { %p2413_p1 = pneg %p2412_p7 }
  0x35   : > { %2243 = dma.hbm_to_vmem [thread:$0]  (!%p2697_p11), %s3061_s4, 512, %s282_s20, [#allocation10], %s2577_s24, %s2577_s24, %s2578_s25  }
  0x36   : > { %p2420_p2 = pnand %p2419_p4, %p2413_p1 }
  0x38   : > { %2423 = shalt.err (!%p2420_p2)
}
  0x39   : > { %s3062_s6 = sld [smem:[#allocation23_spill]]  ;;  %s49_s20 = sadd.s32 1, %s2560_s29 }
  0x3a   : > { %s40_s12 = sadd.s32 1, %s2568_s9  ;;  %p56_p4 = scmp.ne.s32.totalorder %s2560_s29, %s2556_s28 }
  0x3b   : > { %p42_p6 = scmp.ge.s32.totalorder %s40_s12, 2  ;;  %p57_p12 = scmp.eq.s32.totalorder %s2572_s10, 0 }
  0x3c   : > { %p3063_p0 = scmp.eq.s32.totalorder %s2669_s11, 1  ;;  %p2261_p3 = scmp.lt.s32.totalorder %s2572_s10, 2 }
  0x3d   : > { %s3083_s12 = smov (%p42_p6, %s40_s12), 0  ;;  %p58_p10 = por %p57_p12, %p56_p4 }
  0x3e   : > { %p2734_p5 = por %p3063_p0, %p56_p4  ;;  %3065 = sst [smem:[#allocation19_spill]] %s3083_s12 }
  0x3f   : > { %2246 = dma.hbm_to_vmem [thread:$0]  (!%p2697_p11), %s3062_s6, 512, %s298_s22, [#allocation10], %s2577_s24, %s2577_s24, %s2578_s25  }
  0x40   : > { %s314_s16 = sand.u32 1, %s2560_s29   ;;  %s44_s19 = ssub.s32 %s2568_s9, %s3083_s12 }
  0x41   : > { %p47_p11 = scmp.eq.s32.totalorder %s44_s19, 0  ;;  %s2074_s22 = sshll.u32 %s314_s16, 3 }
  0x42   : > { %s2075_s24 = sshll.u32 %s2568_s9, 7  ;;  %s3066_s0 = sld [smem:[#allocation20_spill]] }
  0x43   : > { %s2746_s25 = scalar_select %p47_p11, %s2560_s29, %s49_s20  }
  0x44   : > { %s318_s26 = scalar_lea.vmem [#allocation3], %s2074_s22  ;;  %p2753_p7 = pnand %p2261_p3, %p58_p10 }
  0x45   : > { %s326_s2 = sshll.u32 %s318_s26, 4  ;;  %s2760_s19 = scalar_lea.hbm %s3039_s1, %s2075_s24  ;;  %s327_s2 = int_to_ptr.vmem [resolvable:$true] %s326_s2 }
  0x46   : > { %s333_s20 = sand.u32 1, %s2572_s10   ;;  %s315_s12 = scalar_lea.sflag [#allocation4], %s314_s16 }
  0x47   : > { %p2426_p1 = pneg %p2753_p7  ;;  %s2437_s21 = scalar_lea.vmem %s327_s2, 128 }
  0x48   : > { %s324_s23 = scalar_lea.hbm %s3066_s0, %s2075_s24  ;;  %p2438_p9 = scmp.ne.s32.totalorder %s327_s2, %s2437_s21 }
  0x49   : > { %s2579_s17 = smov [#allocation3]  }
  0x4a   : > { %p2440_p13 = pnand %p2438_p9, %p2426_p1  ;;  %s2442_s26 = sshll.u32 %s2579_s17, 4  ;;  %s2443_s26 = int_to_ptr.vmem [resolvable:$false] %s2442_s26 }
  0x4b   : > { %s2444_s0 = scalar_lea.vmem %s2443_s26, 256  ;;  %p2445_p4 = scmp.lt.s32.totalorder %s327_s2, %s2443_s26 }
  0x4c   : > { %p2441_p2 = pneg %p2440_p13  ;;  %p2446_p6 = scmp.lt.s32.totalorder %s2444_s0, %s2437_s21 }
  0x4e   : > { %p2447_p12 = por %p2446_p6, %p2445_p4 }
  0x50   : > { %p2448_p0 = pnand %p2447_p12, %p2441_p2 }
  0x52   : > { %2451 = shalt.err (!%p2448_p0)
}
  0x53   : > { %2250 = dma.hbm_to_vmem [thread:$0]  (!%p2753_p7), %s324_s23, 128, %s327_s2, %s315_s12  }
  0x54   : > { %s337_s6 = scalar_lea.vmem [#allocation6], %s2074_s22  ;;  %s334_s16 = scalar_lea.sflag [#allocation7], %s333_s20 }
  0x55   : > { %s344_s14 = sshll.u32 %s337_s6, 4  ;;  %s2580_s17 = smov [#allocation6]   ;;  %s345_s14 = int_to_ptr.vmem [resolvable:$true] %s344_s14 }
  0x56   : > { %s2465_s24 = scalar_lea.vmem %s345_s14, 128  ;;  %s2470_s26 = sshll.u32 %s2580_s17, 4  ;;  %s2471_s26 = int_to_ptr.vmem [resolvable:$false] %s2470_s26 }
  0x57   : > { %p2466_p3 = scmp.ne.s32.totalorder %s345_s14, %s2465_s24  ;;  %s2472_s0 = scalar_lea.vmem %s2471_s26, 256 }
  0x58   : > { %p2473_p9 = scmp.lt.s32.totalorder %s345_s14, %s2471_s26  ;;  %p2474_p13 = scmp.lt.s32.totalorder %s2472_s0, %s2465_s24 }
  0x59   : > { %p2468_p10 = pnand %p2466_p3, %p2426_p1 }
  0x5a   : > { %p2475_p2 = por %p2474_p13, %p2473_p9 }
  0x5b   : > { %p2469_p11 = pneg %p2468_p10 }
  0x5d   : > { %p2476_p4 = pnand %p2475_p2, %p2469_p11 }
  0x5f   : > { %2479 = shalt.err (!%p2476_p4)
}
  0x60   : > { %2253 = dma.hbm_to_vmem [thread:$0]  (!%p2753_p7), %s2760_s19, 128, %s345_s14, %s334_s16  }
  0x61   : > { %353 = sbr.rel (%p2688_p8) target bundleno = 1532 (0x5fc), region = 52  ;;  %s2779_s2 = sand.u32 (!%p2688_p8), 1, %s2556_s28  }
  0x62   : > { %s2782_s12 = sshll.u32 (!%p2688_p8), %s2779_s2, 3  ;;  %s356_s22 = scalar_lea.sflag (!%p2688_p8), [#allocation4], %s2779_s2 }
  0x63   : > { %s359_s23 = scalar_lea.vmem (!%p2688_p8), [#allocation3], %s2782_s12  ;;  %p3068_p1 = scmp.ne.s32.totalorder (!%p2688_p8), %s3055_s13, 0 }
  0x66   : > { %2531 = dma.done.wait (%p3068_p1), %s356_s22, 128  }
  0x67   : > { %2533 = vsyncadd (%p3068_p1), %s356_s22, 4294967168  ;;  %s364_s4 = sand.u32 1, %s2669_s11   ;;  %s368_s19 = scalar_lea.vmem [#allocation6], %s2782_s12 }
  0x68   : > { %s365_s15 = scalar_lea.sflag [#allocation7], %s364_s4 }
  0x69   : > { %2535 = dma.done.wait (%p3068_p1), %s365_s15, 128  }
  0x6a   : > { %2537 = vsyncadd (%p3068_p1), %s365_s15, 4294967168  ;;  %p3069_p8 = scmp.eq.s32.totalorder %s2669_s11, 0 }
  0x6c   : > { %2539 = dma.done.wait (%p3069_p8), [#allocation7], 512   ;;  %p3070_p7 = pmov %p3069_p8 }
  0x6e   : > { %2541 = vsyncadd (%p3070_p7), [#allocation7], 4294966784  ;;  %p3071_p6 = pmov %p3070_p7 }
  0x70   : > { %2543 = dma.done.wait (%p3071_p6), [#allocation10], 1024   ;;  %p3072_p12 = pmov %p3071_p6 }
  0x71   : > { %v2581_v0 = vmov 0.0   ;;  %vm2582_vm0 = vmmov 0   ;;  %v426_v1 = vld [vmem:[#allocation9 + $0x18] sm:$0xff]  ;;  %v425_v2 = vld [vmem:[#allocation9 + $0x10] sm:$0xff]  ;;  %v424_v5 = vld [vmem:[#allocation9 + $0x8] sm:$0xff]  ;;  %vm434_vm1 = vcmask 261120   ;;  %v613_v24 = vlaneseq }
  0x72   : > { %2545 = vsyncadd (%p3072_p12), [#allocation10], 4294966272  ;;  %2146 = vmatprep.subr.mxu0 %v2581_v0  ;;  %2157 = vmatprep.subr.mxu1 %v2581_v0  ;;  %v514_v3 = vld [vmem:[#allocation8 + $0x18] sm:$0xff]  ;;  %v513_v4 = vld [vmem:[#allocation8 + $0x10] sm:$0xff]  ;;  %vm508_vm2 = vcmask 523264   ;;  %s2583_s6 = smov 120  }
  0x73   : > { %2154 = vmatprep.mubr.msk.f32.mxu0 %vm2582_vm0, %v2581_v0  ;;  %2165 = vmatprep.mubr.msk.f32.mxu1 %vm2582_vm0, %v2581_v0  ;;  %v512_v6 = vld [vmem:[#allocation8 + $0x8] sm:$0xff]  ;;  %v423_v7 = vld [vmem:[#allocation9] sm:$0xff]  ;;  %v422_v9 = vld [vmem:[%s368_s19] sm:$0xff]  ;;  %s2584_s14 = smov 104   ;;  %s2585_s16 = smov 112   ;;  %v614_v28 = vshrl.u32 %v613_v24, 7 }
  0x74   : > { %2147 = vmatpush3.msra.mxu0 %v426_v1  ;;  %2158 = vmatpush3.msra.mxu1 %v514_v3  ;;  %v511_v8 = vld [vmem:[#allocation8] sm:$0xff]  ;;  %v2085_v11 = vld [vmem:[%s3043_s5] ss:$0 sm:$0xff]  ;;  %v2586_v22 = vmov 1983009808   ;;  %vm1038_vm3 = vcmask 64512  }
  0x75   : > { %2148 = vmatprep.subr.mxu0 %v2581_v0  ;;  %2159 = vmatprep.subr.mxu1 %v2581_v0  ;;  %v510_v10 = vld [vmem:[%s359_s23] sm:$0xff]  ;;  %v2087_v12 = vld [vmem:[%s3041_s3] ss:$0 sm:$0xff]  ;;  %v611_v23 = vunpack.c.l.s4 %v2586_v22  ;;  %v2587_v25 = vmov 1934713408   ;;  %s2588_s24 = smov 96  }
  0x76   : > { %2149 = vmatpush3.msra.mxu0 %v425_v2  ;;  %2160 = vmatpush3.msra.mxu1 %v513_v4  ;;  %v643_v26 = vunpack.c.l.s4 %v2587_v25  ;;  %s2589_s17 = smov 16   ;;  %s2590_s26 = smov 8   ;;  %vm1832_vm4 = vcmask 130048   ;;  %vm1834_vm5 = vcmask 195584  }
  0x77   : > { %2150 = vmatprep.subr.mxu0 %v2581_v0  ;;  %2161 = vmatprep.subr.mxu1 %v2581_v0  ;;  %v612_v27 = vunpack.c.0.s8 %v611_v23  ;;  %s2591_s0 = smov 24   ;;  %s2112_s4 = sshll.u32 %s2564_s30, 7 }
  0x78   : > { %2151 = vmatpush3.msra.mxu0 %v424_v5  ;;  %2162 = vmatpush3.msra.mxu1 %v512_v6  ;;  %v644_v31 = vunpack.c.0.s8 %v643_v26  ;;  %s417_s15 = scalar_lea.vmem [#allocation12], %s2782_s12  ;;  %s2995_s20 = scalar_lea.hbm %s3046_s8, %s2112_s4 }
  0x79   : > { %2152 = vmatprep.subr.mxu0 %v2581_v0  ;;  %2163 = vmatprep.subr.mxu1 %v2581_v0  ;;  %v2843_v32 = vsub.s32 %v612_v27, %v614_v28  ;;  %s1936_s19 = sshll.u32 %s417_s15, 4  ;;  %s1922_s21 = scalar_lea.sflag [#allocation5], %s2779_s2  ;;  %s1937_s19 = int_to_ptr.vmem [resolvable:$true] %s1936_s19 }
  0x7a   : > { %2153 = vmatpush3.msra.mxu0 %v423_v7  ;;  %2164 = vmatpush3.msra.mxu1 %v511_v8  ;;  %v2855_v39 = vsub.s32 %v644_v31, %v614_v28  ;;  %s2592_s30 = smov [#allocation12]  }
  0x7b   : > { %2155 = vmatmul.mubr.msk.f32.vlgmr.msra.gmra.mxu0 %vm434_vm1, %v422_v9  ;;  %2166 = vmatmul.mubr.msk.f32.vlgmr.msra.gmra.mxu1 %vm434_vm1, %v510_v10  ;;  %s2484_s12 = sshll.u32 %s2592_s30, 4  ;;  %s2485_s12 = int_to_ptr.vmem [resolvable:$false] %s2484_s12 }
  0x7c   : > { %2168 = vmatprep.subr.mxu1 %v2581_v0  ;;  %2178 = vmatprep.subr.mxu0 %v2581_v0  ;;  %p2487_p11 = scmp.lt.s32.totalorder %s1937_s19, %s2485_s12 }
  0x7d   : > { %2170 = vmatprep.mubr.msk.f32.mxu1 %vm2582_vm0, %v2581_v0  ;;  %2180 = vmatprep.mubr.msk.f32.mxu0 %vm2582_vm0, %v2581_v0 }
 0x13b   : > { %v504_v13 = vpop.f32.mrf.mxu0  ;;  %v592_v14 = vpop.f32.mrf.mxu1 }
 0x13c   : > { %v505_v15 = vadd.f32 %v2085_v11, %v504_v13  ;;  %v593_v16 = vadd.f32 %v2087_v12, %v592_v14 }
 0x13d   : > { %v2156_v17 = vpop.f32.mrf.mxu0  ;;  %v2167_v18 = vpop.f32.mrf.mxu1 }
 0x13e   : > { %509 = vst.msk [vmem:[#allocation2] sm:$0xff] %vm508_vm2, %v505_v15  ;;  %v596_v19 = vmul.f32 0.35355338, %v593_v16 }
 0x140   : > { %599 = vrot.lane.b32.xlu1 %v596_v19, %s2583_s6 }
 0x145   : > { %v2834_v20 = vld [vmem:[#allocation2] sm:$0xff] }
 0x146   : > { %751 = vrot.lane.b32.xlu1 %v2834_v20, %s2584_s14  ;;  %745 = vrot.lane.b32.xlu0 %v2834_v20, %s2583_s6  ;;  %s2480_s6 = scalar_lea.vmem %s1937_s19, 128 }
 0x147   : > { %p2481_p0 = scmp.ne.s32.totalorder %s1937_s19, %s2480_s6 }
 0x149   : > { %p2482_p3 = pnand %p2481_p0, %p2734_p5 }
 0x14a   : > { %605 = vrot.lane.b32.xlu1 %v596_v19, %s2584_s14  ;;  %748 = vrot.lane.b32.xlu0 %v2834_v20, %s2585_s16  ;;  %s2486_s14 = scalar_lea.vmem %s2485_s12, 256 }
 0x14b   : > { %p2483_p10 = pneg %p2482_p3  ;;  %p2488_p9 = scmp.lt.s32.totalorder %s2486_s14, %s2480_s6 }
 0x14d   : > { %p2489_p13 = por %p2488_p9, %p2487_p11 }
 0x14e   : > { %602 = vrot.lane.b32.xlu0 %v596_v19, %s2585_s16 }
 0x14f   : > { %p2490_p2 = pnand %p2489_p13, %p2483_p10 }
 0x1b2   : > { %v600_v21 = vpop.permute.xlu1 %599 }
 0x1b8   : > { %v2839_v29 = vpop.permute.xlu1 %751  ;;  %v2841_v30 = vpop.permute.xlu0 %745 }
 0x1b9   : > { %v770_v33 = vcombine.low %v2841_v30, %v2839_v29  ;;  %v771_v34 = vcombine.high %v2841_v30, %v2839_v29 }
 0x1bb   : > { %v778_v40 = vrot.slane %v770_v33, %v2843_v32  ;;  %v785_v41 = vrot.slane %v771_v34, %v2843_v32 }
 0x1bc   : > { %v2849_v35 = vpop.permute.xlu0 %748  ;;  %v606_v36 = vpop.permute.xlu1 %605 }
 0x1bd   : > { %v754_v37 = vcombine.low %v2834_v20, %v2849_v35  ;;  %v755_v38 = vcombine.high %v2834_v20, %v2849_v35  ;;  %v624_v44 = vcombine.low %v600_v21, %v606_v36  ;;  %v625_v45 = vcombine.high %v600_v21, %v606_v36 }
 0x1bf   : > { %v762_v42 = vrot.slane %v754_v37, %v2843_v32  ;;  %v769_v43 = vrot.slane %v755_v38, %v2843_v32  ;;  %v632_v57 = vrot.slane %v624_v44, %v2843_v32  ;;  %v639_v58 = vrot.slane %v625_v45, %v2843_v32 }
 0x1c0   : > { %v603_v46 = vpop.permute.xlu0 %602 }
 0x1c1   : > { %v786_v47 = vcombine.low %v762_v42, %v778_v40  ;;  %v787_v48 = vcombine.high %v762_v42, %v778_v40  ;;  %v802_v49 = vcombine.low %v769_v43, %v785_v41  ;;  %v803_v50 = vcombine.high %v769_v43, %v785_v41 }
 0x1c2   : > { %v608_v51 = vcombine.low %v596_v19, %v603_v46  ;;  %v609_v52 = vcombine.high %v596_v19, %v603_v46 }
 0x1c3   : > { %v794_v53 = vrot.slane %v786_v47, %v2855_v39  ;;  %v801_v54 = vrot.slane %v787_v48, %v2855_v39  ;;  %v810_v55 = vrot.slane %v802_v49, %v2855_v39  ;;  %v817_v56 = vrot.slane %v803_v50, %v2855_v39 }
 0x1c4   : > { %v616_v59 = vrot.slane %v608_v51, %v2843_v32  ;;  %v623_v60 = vrot.slane %v609_v52, %v2843_v32 }
 0x1c5   : > { %v822_v61 = vcombine.low %v794_v53, %v801_v54  ;;  %v2091_v62 = vcombine.high %v794_v53, %v801_v54  ;;  %v838_v63 = vcombine.low %v810_v55, %v817_v56  ;;  %v2092_v1 = vcombine.high %v810_v55, %v817_v56 }
 0x1c6   : > { %v640_v2 = vcombine.low %v616_v59, %v632_v57  ;;  %v641_v3 = vcombine.high %v616_v59, %v632_v57  ;;  %v656_v4 = vcombine.low %v623_v60, %v639_v58  ;;  %v657_v5 = vcombine.high %v623_v60, %v639_v58 }
 0x1c7   : > { %v829_v6 = vrot.slane %v822_v61, %v2843_v32  ;;  %v837_v7 = vrot.slane %v2091_v62, %v2843_v32  ;;  %v845_v8 = vrot.slane %v838_v63, %v2843_v32  ;;  %v853_v9 = vrot.slane %v2092_v1, %v2843_v32 }
 0x1c8   : > { %v648_v10 = vrot.slane %v640_v2, %v2855_v39  ;;  %v655_v11 = vrot.slane %v641_v3, %v2855_v39  ;;  %v664_v12 = vrot.slane %v656_v4, %v2855_v39  ;;  %v671_v13 = vrot.slane %v657_v5, %v2855_v39 }
 0x1c9   : > { %v854_v14 = vcombine.low %v829_v6, %v837_v7  ;;  %v855_v15 = vcombine.high %v829_v6, %v837_v7  ;;  %v870_v16 = vcombine.low %v845_v8, %v853_v9  ;;  %v871_v17 = vcombine.high %v845_v8, %v853_v9 }
 0x1ca   : > { %v676_v18 = vcombine.low %v648_v10, %v655_v11  ;;  %v2089_v19 = vcombine.high %v648_v10, %v655_v11  ;;  %v692_v21 = vcombine.low %v664_v12, %v671_v13  ;;  %v2090_v22 = vcombine.high %v664_v12, %v671_v13 }
 0x1cb   : > { %v862_v23 = vrot.slane %v854_v14, %v2855_v39  ;;  %v878_v24 = vrot.slane %v870_v16, %v2855_v39  ;;  %v869_v25 = vrot.slane %v855_v15, %v2855_v39  ;;  %v885_v26 = vrot.slane %v871_v17, %v2855_v39 }
 0x1cc   : > { %v683_v27 = vrot.slane %v676_v18, %v2843_v32  ;;  %v691_v28 = vrot.slane %v2089_v19, %v2843_v32  ;;  %v699_v31 = vrot.slane %v692_v21, %v2843_v32  ;;  %v707_v33 = vrot.slane %v2090_v22, %v2843_v32 }
 0x1cd   : > { %v886_v34 = vcombine.low %v862_v23, %v878_v24  ;;  %v888_v36 = vcombine.low %v869_v25, %v885_v26  ;;  %v887_v48 = vcombine.high %v862_v23, %v878_v24  ;;  %v889_v50 = vcombine.high %v869_v25, %v885_v26 }
 0x1ce   : > { %v708_v37 = vcombine.low %v683_v27, %v691_v28  ;;  %v709_v38 = vcombine.high %v683_v27, %v691_v28  ;;  %v724_v40 = vcombine.low %v699_v31, %v707_v33  ;;  %v725_v41 = vcombine.high %v699_v31, %v707_v33 }
 0x1cf   : > { %2169 = vmatpush3.xpose.msk.msra.mxu1 %vm1038_vm3, %v886_v34  ;;  %2179 = vmatpush3.xpose.msk.msra.mxu0 %vm1038_vm3, %v888_v36 }
 0x1d0   : > { %2173 = vmatprep.subr.mxu1 %v2581_v0  ;;  %v716_v42 = vrot.slane %v708_v37, %v2855_v39  ;;  %v732_v43 = vrot.slane %v724_v40, %v2855_v39  ;;  %v723_v44 = vrot.slane %v709_v38, %v2855_v39  ;;  %v739_v45 = vrot.slane %v725_v41, %v2855_v39 }
 0x1d1   : > { %2188 = vmatprep.subr.mxu0 %v2581_v0 }
 0x1d2   : > { %v740_v46 = vcombine.low %v716_v42, %v732_v43  ;;  %v742_v47 = vcombine.low %v723_v44, %v739_v45  ;;  %v741_v49 = vcombine.high %v716_v42, %v732_v43  ;;  %v743_v51 = vcombine.high %v723_v44, %v739_v45 }
 0x1d4   : > { %2171 = vmatmul.mubr.msk.f32.vlgmr.msra.gmra.mxu1 %vm1038_vm3, %v740_v46  ;;  %2181 = vmatmul.mubr.msk.f32.vlgmr.msra.gmra.mxu0 %vm1038_vm3, %v742_v47 }
 0x1d5   : > { %2174 = vmatpush3.xpose.msk.msra.mxu1 %vm1038_vm3, %v887_v48  ;;  %2175 = vmatprep.mubr.msk.f32.mxu1 %vm2582_vm0, %v2581_v0 }
 0x1d6   : > { %2183 = vmatprep.subr.mxu1 %v2581_v0  ;;  %2190 = vmatprep.mubr.msk.f32.mxu0 %vm2582_vm0, %v2581_v0 }
 0x1d8   : > { %2176 = vmatmul.mubr.msk.f32.vlgmr.msra.gmra.mxu1 %vm1038_vm3, %v741_v49 }
 0x1d9   : > { %2184 = vmatpush3.xpose.msk.msra.mxu1 %vm1038_vm3, %v889_v50  ;;  %2185 = vmatprep.mubr.msk.f32.mxu1 %vm2582_vm0, %v2581_v0 }
 0x1da   : > { %2193 = vmatprep.subr.mxu1 %v2581_v0 }
 0x1dc   : > { %2186 = vmatmul.mubr.msk.f32.vlgmr.msra.gmra.mxu1 %vm1038_vm3, %v743_v51 }
 0x1dd   : > { %2195 = vmatprep.mubr.msk.f32.mxu1 %vm2582_vm0, %v2581_v0 }
 0x294   : > { %v1111_v52 = vpop.f32.mrf.mxu1  ;;  %v1263_v53 = vpop.f32.mrf.mxu0 }
 0x295   : > { %v1343_v54 = vsel %vm1038_vm3, %v1111_v52, -inf  ;;  %v1349_v59 = vsel %vm1038_vm3, %v1263_v53, -inf }
 0x296   : > { %1344 = vmax.xlane.f32.xlu0 %v1343_v54  ;;  %v2172_v55 = vpop.f32.mrf.mxu1  ;;  %v2182_v56 = vpop.f32.mrf.mxu0 }
 0x298   : > { %v1187_v57 = vpop.f32.mrf.mxu1 }
 0x299   : > { %v1346_v58 = vsel %vm1038_vm3, %v1187_v57, -inf }
 0x29a   : > { %1347 = vmax.xlane.f32.xlu1 %v1346_v58  ;;  %v2177_v60 = vpop.f32.mrf.mxu1  ;;  %1350 = vmax.xlane.f32.xlu0 %v1349_v59 }
 0x29c   : > { %v1339_v61 = vpop.f32.mrf.mxu1 }
 0x29d   : > { %v1352_v62 = vsel %vm1038_vm3, %v1339_v61, -inf }
 0x29e   : > { %v2187_v63 = vpop.f32.mrf.mxu1  ;;  %1353 = vmax.xlane.f32.xlu0 %v1352_v62 }
 0x2ab   : > { %890 = vrot.lane.b32.xlu1 %v2834_v20, %s2588_s24 }
 0x31f   : > { %v1345_v1 = vpop.xlane.xlu0 %1344 }
 0x320   : > { %v1355_v2 = vsub.f32 %v1111_v52, %v1345_v1 }
 0x322   : > { %v1359_v3 = vmul.f32 1.442695, %v1355_v2 }
 0x323   : > { %v1348_v4 = vpop.xlane.xlu1 %1347  ;;  %v1351_v5 = vpop.xlane.xlu0 %1350 }
 0x324   : > { %2330 = vpow2.f32 %v1359_v3  ;;  %v1356_v6 = vsub.f32 %v1187_v57, %v1348_v4  ;;  %v1357_v7 = vsub.f32 %v1263_v53, %v1351_v5 }
 0x326   : > { %v1361_v8 = vmul.f32 1.442695, %v1356_v6  ;;  %v1363_v9 = vmul.f32 1.442695, %v1357_v7 }
 0x327   : > { %v1354_v10 = vpop.xlane.xlu0 %1353  ;;  %v891_v21 = vpop.permute.xlu1 %890 }
 0x328   : > { %2332 = vpow2.f32 %v1361_v8  ;;  %v1358_v11 = vsub.f32 %v1339_v61, %v1354_v10 }
 0x329   : > { %2334 = vpow2.f32 %v1363_v9 }
 0x32a   : > { %v1365_v12 = vmul.f32 1.442695, %v1358_v11 }
 0x32c   : > { %2336 = vpow2.f32 %v1365_v12  ;;  %v1839_v12 = vld [vmem:[#allocation11 + $0x18] sm:$0xff] }
 0x331   : > { %v2915_v13 = vpop.eup %2330 }
 0x332   : > { %v1367_v20 = vsel %vm1038_vm3, %v2915_v13, 0.0 }
 0x333   : > { %1368 = vadd.xlane.f32.xlu1 %v1367_v20 }
 0x335   : > { %v2333_v14 = vpop.eup %2332 }
 0x336   : > { %v2919_v15 = vpop.eup %2334  ;;  %v1370_v16 = vsel %vm1038_vm3, %v2333_v14, 0.0 }
 0x337   : > { %1371 = vadd.xlane.f32.xlu0 %v1370_v16  ;;  %v1373_v17 = vsel %vm1038_vm3, %v2919_v15, 0.0 }
 0x338   : > { %1374 = vadd.xlane.f32.xlu1 %v1373_v17 }
 0x339   : > { %v2924_v18 = vpop.eup %2336 }
 0x33a   : > { %v1376_v19 = vsel %vm1038_vm3, %v2924_v18, 0.0 }
 0x33b   : > { %1377 = vadd.xlane.f32.xlu0 %v1376_v19 }
 0x349   : > { %894 = vrot.lane.b32.xlu1 %v2849_v35, %s2588_s24 }
 0x34d   : > { %896 = vrot.lane.b32.xlu1 %v2839_v29, %s2588_s24 }
 0x351   : > { %892 = vrot.lane.b32.xlu0 %v2841_v30, %s2588_s24 }
 0x3bc   : > { %v1369_v22 = vpop.xlane.xlu1 %1368 }
 0x3bd   : > { %2338 = vrcp.f32 %v1369_v22 }
 0x3c0   : > { %v1372_v23 = vpop.xlane.xlu0 %1371 }
 0x3c1   : > { %v1375_v24 = vpop.xlane.xlu1 %1374  ;;  %2340 = vrcp.f32 %v1372_v23 }
 0x3c2   : > { %2342 = vrcp.f32 %v1375_v24 }
 0x3c4   : > { %v1378_v25 = vpop.xlane.xlu0 %1377 }
 0x3c5   : > { %v895_v26 = vpop.permute.xlu1 %894  ;;  %2344 = vrcp.f32 %v1378_v25 }
 0x3c6   : > { %v902_v27 = vcombine.low %v891_v21, %v895_v26  ;;  %v903_v28 = vcombine.high %v891_v21, %v895_v26 }
 0x3c8   : > { %v893_v31 = vpop.permute.xlu0 %892  ;;  %v910_v35 = vrot.slane %v902_v27, %v2843_v32  ;;  %v917_v29 = vrot.slane %v903_v28, %v2843_v32 }
 0x3c9   : > { %v897_v33 = vpop.permute.xlu1 %896 }
 0x3ca   : > { %v918_v34 = vcombine.low %v893_v31, %v897_v33  ;;  %v919_v36 = vcombine.high %v893_v31, %v897_v33  ;;  %v2339_v59 = vpop.eup %2338 }
 0x3cb   : > { %v1387_v5 = vmul.f32 %v2339_v59, %v2915_v13 }
 0x3cc   : > { %v926_v30 = vrot.slane %v918_v34, %v2843_v32  ;;  %v933_v37 = vrot.slane %v919_v36, %v2843_v32 }
 0x3ce   : > { %v934_v38 = vcombine.low %v910_v35, %v926_v30  ;;  %v935_v40 = vcombine.high %v910_v35, %v926_v30  ;;  %v950_v41 = vcombine.low %v917_v29, %v933_v37  ;;  %v951_v42 = vcombine.high %v917_v29, %v933_v37  ;;  %v2341_v60 = vpop.eup %2340  ;;  %v1838_v35 = vld [vmem:[#allocation11 + $0x10] sm:$0xff]  ;;  %v1837_v29 = vld [vmem:[#allocation11 + $0x8] sm:$0xff] }
 0x3cf   : > { %v2343_v2 = vpop.eup %2342  ;;  %v1388_v6 = vmul.f32 %v2341_v60, %v2333_v14 }
 0x3d0   : > { %v942_v43 = vrot.slane %v934_v38, %v2855_v39  ;;  %v949_v44 = vrot.slane %v935_v40, %v2855_v39  ;;  %v958_v45 = vrot.slane %v950_v41, %v2855_v39  ;;  %v965_v46 = vrot.slane %v951_v42, %v2855_v39 }
 0x3d1   : > { %v1389_v10 = vmul.f32 %v2343_v2, %v2919_v15  ;;  %v2109_v2 = vld [vmem:[%s3045_s7] ss:$0 sm:$0xff] }
 0x3d2   : > { %v970_v47 = vcombine.low %v942_v43, %v949_v44  ;;  %v2093_v48 = vcombine.high %v942_v43, %v949_v44  ;;  %v986_v49 = vcombine.low %v958_v45, %v965_v46  ;;  %v2094_v50 = vcombine.high %v958_v45, %v965_v46  ;;  %v2345_v7 = vpop.eup %2344  ;;  %v1836_v45 = vld [vmem:[#allocation11] sm:$0xff] }
 0x3d3   : > { %v1390_v11 = vmul.f32 %v2345_v7, %v2924_v18 }
 0x3d4   : > { %v977_v51 = vrot.slane %v970_v47, %v2843_v32  ;;  %v985_v52 = vrot.slane %v2093_v48, %v2843_v32  ;;  %v993_v53 = vrot.slane %v986_v49, %v2843_v32  ;;  %v1001_v54 = vrot.slane %v2094_v50, %v2843_v32 }
 0x3d6   : > { %v1002_v55 = vcombine.low %v977_v51, %v985_v52  ;;  %v1018_v56 = vcombine.low %v993_v53, %v1001_v54  ;;  %v1003_v57 = vcombine.high %v977_v51, %v985_v52  ;;  %v1019_v58 = vcombine.high %v993_v53, %v1001_v54 }
 0x3d8   : > { %v1010_v61 = vrot.slane %v1002_v55, %v2855_v39  ;;  %v1026_v62 = vrot.slane %v1018_v56, %v2855_v39  ;;  %v1017_v63 = vrot.slane %v1003_v57, %v2855_v39  ;;  %v1033_v1 = vrot.slane %v1019_v58, %v2855_v39 }
 0x3da   : > { %v1034_v3 = vcombine.low %v1010_v61, %v1026_v62  ;;  %v1035_v4 = vcombine.high %v1010_v61, %v1026_v62  ;;  %v1036_v8 = vcombine.low %v1017_v63, %v1033_v1  ;;  %v1037_v9 = vcombine.high %v1017_v63, %v1033_v1 }
 0x3dc   : > { %2189 = vmatpush3.msra.mxu0 %v1034_v3  ;;  %2194 = vmatpush3.msra.mxu1 %v1035_v4 }
 0x3dd   : > { %2191 = vmatmul.mubr.msk.f32.vlgmr.msra.gmra.mxu0 %vm1038_vm3, %v1387_v5  ;;  %2196 = vmatmul.mubr.msk.f32.vlgmr.msra.gmra.mxu1 %vm1038_vm3, %v1388_v6 }
 0x3de   : > { %2198 = vmatprep.subr.mxu0 %v2581_v0  ;;  %2203 = vmatprep.subr.mxu1 %v2581_v0 }
 0x3df   : > { %2199 = vmatpush3.msra.mxu0 %v1036_v8  ;;  %2204 = vmatpush3.msra.mxu1 %v1037_v9 }
 0x3e0   : > { %2200 = vmatprep.mubr.msk.f32.mxu0 %vm2582_vm0, %v2581_v0  ;;  %2205 = vmatprep.mubr.msk.f32.mxu1 %vm2582_vm0, %v2581_v0 }
 0x3e1   : > { %2201 = vmatmul.mubr.msk.f32.vlgmr.msra.gmra.mxu0 %vm1038_vm3, %v1389_v10  ;;  %2206 = vmatmul.mubr.msk.f32.vlgmr.msra.gmra.mxu1 %vm1038_vm3, %v1390_v11 }
 0x3e2   : > { %2208 = vmatprep.subr.mxu0 %v2581_v0  ;;  %2216 = vmatprep.mubr.msk.f32.mxu0 %vm2582_vm0, %v2581_v0 }
 0x3e3   : > { %2209 = vmatpush3.msra.mxu0 %v1839_v12 }
 0x3e4   : > { %2210 = vmatprep.subr.mxu0 %v2581_v0 }
 0x3e5   : > { %2211 = vmatpush3.msra.mxu0 %v1838_v35 }
 0x3e6   : > { %2212 = vmatprep.subr.mxu0 %v2581_v0 }
 0x3e7   : > { %2213 = vmatpush3.msra.mxu0 %v1837_v29 }
 0x3e8   : > { %2214 = vmatprep.subr.mxu0 %v2581_v0 }
 0x3e9   : > { %2215 = vmatpush3.msra.mxu0 %v1836_v45 }
 0x49d   : > { %v1460_v13 = vpop.f32.mrf.mxu0  ;;  %v1533_v20 = vpop.f32.mrf.mxu1 }
 0x49f   : > { %v2192_v14 = vpop.f32.mrf.mxu0  ;;  %v2197_v15 = vpop.f32.mrf.mxu1 }
 0x4a1   : > { %v1606_v16 = vpop.f32.mrf.mxu0  ;;  %v1679_v17 = vpop.f32.mrf.mxu1 }
 0x4a2   : > { %v1683_v18 = vcombine.low %v1460_v13, %v1606_v16  ;;  %v1684_v19 = vcombine.high %v1460_v13, %v1606_v16  ;;  %v1699_v21 = vcombine.low %v1533_v20, %v1679_v17  ;;  %v1700_v22 = vcombine.high %v1533_v20, %v1679_v17 }
 0x4a3   : > { %v2202_v23 = vpop.f32.mrf.mxu0  ;;  %v2207_v24 = vpop.f32.mrf.mxu1 }
 0x4a4   : > { %v1691_v25 = vrot.slane %v1683_v18, %v2843_v32  ;;  %v1698_v26 = vrot.slane %v1684_v19, %v2843_v32  ;;  %v1707_v27 = vrot.slane %v1699_v21, %v2843_v32  ;;  %v1714_v28 = vrot.slane %v1700_v22, %v2843_v32 }
 0x4a6   : > { %v1715_v31 = vcombine.low %v1691_v25, %v1707_v27  ;;  %v1716_v33 = vcombine.high %v1691_v25, %v1707_v27  ;;  %v1731_v34 = vcombine.low %v1698_v26, %v1714_v28  ;;  %v1732_v36 = vcombine.high %v1698_v26, %v1714_v28 }
 0x4a8   : > { %v1723_v30 = vrot.slane %v1715_v31, %v2855_v39  ;;  %v1730_v37 = vrot.slane %v1716_v33, %v2855_v39  ;;  %v1739_v38 = vrot.slane %v1731_v34, %v2855_v39  ;;  %v1746_v40 = vrot.slane %v1732_v36, %v2855_v39 }
 0x4aa   : > { %v1751_v41 = vcombine.low %v1723_v30, %v1730_v37  ;;  %v2107_v42 = vcombine.high %v1723_v30, %v1730_v37  ;;  %v1767_v43 = vcombine.low %v1739_v38, %v1746_v40  ;;  %v2108_v44 = vcombine.high %v1739_v38, %v1746_v40 }
 0x4ac   : > { %v1758_v46 = vrot.slane %v1751_v41, %v2843_v32  ;;  %v1766_v47 = vrot.slane %v2107_v42, %v2843_v32  ;;  %v1774_v48 = vrot.slane %v1767_v43, %v2843_v32  ;;  %v1782_v49 = vrot.slane %v2108_v44, %v2843_v32 }
 0x4ae   : > { %v1784_v50 = vcombine.high %v1758_v46, %v1766_v47  ;;  %v1800_v51 = vcombine.high %v1774_v48, %v1782_v49  ;;  %v1783_v52 = vcombine.low %v1758_v46, %v1766_v47  ;;  %v1799_v53 = vcombine.low %v1774_v48, %v1782_v49 }
 0x4b0   : > { %v1798_v54 = vrot.slane %v1784_v50, %v2855_v39  ;;  %v1814_v55 = vrot.slane %v1800_v51, %v2855_v39  ;;  %v1791_v0 = vrot.slane %v1783_v52, %v2855_v39  ;;  %v1807_v56 = vrot.slane %v1799_v53, %v2855_v39 }
 0x4b2   : > { %v1817_v57 = vcombine.low %v1798_v54, %v1814_v55  ;;  %v1816_v58 = vcombine.high %v1791_v0, %v1807_v56  ;;  %v1815_v59 = vcombine.low %v1791_v0, %v1807_v56  ;;  %v1818_v32 = vcombine.high %v1798_v54, %v1814_v55 }
 0x4b4   : > { %1824 = vrot.lane.b32.xlu1 %v1817_v57, %s2589_s17  ;;  %1820 = vrot.lane.b32.xlu0 %v1816_v58, %s2590_s26 }
 0x4b8   : > { %1828 = vrot.lane.b32.xlu0 %v1818_v32, %s2591_s0 }
 0x526   : > { %v1821_v60 = vpop.permute.xlu0 %1820  ;;  %v1825_v61 = vpop.permute.xlu1 %1824 }
 0x527   : > { %v1831_v62 = vsel %vm1038_vm3, %v1815_v59, %v1821_v60 }
 0x528   : > { %v1833_v63 = vsel %vm1832_vm4, %v1831_v62, %v1825_v61 }
 0x52a   : > { %v1829_v39 = vpop.permute.xlu0 %1828 }
 0x52b   : > { %v1835_v1 = vsel %vm1834_vm5, %v1833_v63, %v1829_v39 }
 0x52c   : > { %2217 = vmatmul.mubr.msk.f32.vlgmr.msra.gmra.mxu0 %vm434_vm1, %v1835_v1 }
 0x5ec   : > { %v1916_v3 = vpop.f32.mrf.mxu0 }
 0x5ed   : > { %v1917_v4 = vadd.f32 %v2109_v2, %v1916_v3 }
 0x5ee   : > { %v2218_v5 = vpop.f32.mrf.mxu0 }
 0x5ef   : > { %1920 = vst.msk [vmem:[%s417_s15] sm:$0xff] %vm434_vm1, %v1917_v4 }
 0x5f0   : > { %2493 = shalt.err (!%p2490_p2)
}
 0x5f1   : > { %s2494_s16 = scalar_lea.hbm %s2995_s20, 128  ;;  %s2498_s17 = scalar_lea.hbm %s3046_s8, 256 }
 0x5f2   : > { %p2495_p4 = scmp.ne.s32.totalorder %s2995_s20, %s2494_s16  ;;  %p2499_p7 = scmp.lt.s32.totalorder %s2995_s20, %s3046_s8 }
 0x5f3   : > { %p2500_p6 = scmp.lt.s32.totalorder %s2498_s17, %s2494_s16 }
 0x5f4   : > { %p2496_p1 = pnand %p2495_p4, %p2734_p5 }
 0x5f5   : > { %p2501_p12 = por %p2500_p6, %p2499_p7 }
 0x5f6   : > { %p2497_p8 = pneg %p2496_p1 }
 0x5f8   : > { %p2502_p0 = pnand %p2501_p12, %p2497_p8 }
 0x5fa   : > { %2505 = shalt.err (!%p2502_p0)
}
 0x5fb   : > { %2235 = dma.vmem_to_hbm [thread:$0]  (%p2734_p5), %s1937_s19, 128, %s2995_s20, %s1922_s21  }
 0x5fc PF: > { %s3073_s22 = sld [smem:[#allocation18_spill]]  ;;  %s1948_s23 = sand.u32 1, %s2552_s27  }
 0x5fd   : > { %p3075_p10 = scmp.ge.s32.totalorder %s2572_s10, 2  ;;  %s1949_s4 = scalar_lea.sflag [#allocation5], %s1948_s23 }
 0x602   : > { %p3074_p3 = scmp.ne.s32.totalorder %s3073_s22, 0 }
 0x604   : > { %p2255_p11 = pnand %p3075_p10, %p3074_p3 }
 0x606   : > { %p2256_p9 = pneg %p2255_p11 }
 0x608   : > { %2547 = dma.done.wait (%p2256_p9), %s1949_s4, 128  }
 0x609   : > { %2549 = vsyncadd (%p2256_p9), %s1949_s4, 4294967168  ;;  %s28_s10 = sadd.s32 1, %s2572_s10   ;;  %s3076_s18 = sld [smem:[#allocation19_spill]] }
 0x60a   : > { %p25_p13 = scmp.ge.s32.totalorder %s28_s10, 4   ;;  %s3077_s27 = smov %s2556_s28 }
 0x60b   : > { %s3078_s28 = smov %s2560_s29  ;;  %s3079_s29 = smov %s2746_s25 }
 0x60c   : > { %s3080_s30 = smov %s2568_s9  ;;  %27 = sbr.rel (!%p25_p13) target bundleno = 14 (0xe), region = 126 }
 0x60f   : > { %s3081_s9 = smov %s3076_s18 }
 0x611   :  { %1954 = vsyncpa [#allocation4], 1 }
 0x612   :  { %1956 = vsyncpa [#allocation4 + $0x1], 1 }
 0x613   :  { %1957 = vsyncpa [#allocation7], 1 }
 0x614   :  { %1959 = vsyncpa [#allocation7 + $0x1], 1 }
 0x615   :  { %1960 = vsyncpa [#allocation10], 1 }
 0x616   :  { %1961 = vsyncpa [#allocation5], 1 }
 0x617   :  { %1963 = vsyncpa [#allocation5 + $0x1], 1 }

</bundles_post_ra>
